<compile_context>
chip_gen: v5e
topology: v5e:2x2
jax: 0.10.0
libtpu: 0.0.40
codegen_flags: <defaults>
</compile_context>

<pallas_src>
import jax
import jax.numpy as jnp
from jax.experimental import pallas as pl
from jax.experimental.pallas import tpu as pltpu

_ROW_ALIGN = 128      # tile rows: multiple of 128 (lane-dense output slab)
_MAX_TB = 8192        # cap on rows per grid step


def _round_up(x, m):
    return ((x + m - 1) // m) * m


def _vmem_capacity_bytes():
    try:
        return int(pltpu.get_tpu_info().vmem_capacity_bytes)
    except Exception:
        # Fallback: assume the smallest per-core VMEM of supported gens (v7x).
        return 64 * 1024 * 1024


def _mlp_kernel(x_ref, w1_ref, b1_ref, w2_ref, b2_ref, w3_ref, b3_ref, o_ref):
    # Layer 1: (TB, D) @ (D, 64); f32 accumulate, bias + ReLU in f32.
    h1 = jnp.dot(x_ref[...], w1_ref[...], preferred_element_type=jnp.float32)
    h1 = jnp.maximum(h1 + b1_ref[...], 0.0).astype(w2_ref.dtype)

    # Layer 2: (TB, 64) @ (64, 32); f32 accumulate, bias + ReLU in f32.
    h2 = jnp.dot(h1, w2_ref[...], preferred_element_type=jnp.float32)
    h2 = jnp.maximum(h2 + b2_ref[...], 0.0)          # keep f32 for the reduce

    # Layer 3 (32 -> 1): VPU multiply + XLU lane reduction instead of an N=1
    # MXU matmul, fused with the lane-dense (rows, 128) output store.
    rows, lanes = o_ref.shape[1], o_ref.shape[2]
    h2r = h2.reshape(rows, lanes, h2.shape[-1])       # split sublane dim only
    w3r = w3_ref[...].astype(jnp.float32).reshape(1, 1, -1)
    out = jnp.sum(h2r * w3r, axis=-1) + b3_ref[...]   # (rows, lanes) + (1, 1)
    o_ref[...] = out[None, ...].astype(o_ref.dtype)


def payment_model_forward(x, params, *, block_batch=None, use_bf16=True):
    """Forward pass of PaymentModel.

    x: (B, input_dim) float array.
    params: dict with w1 (D,64), b1 (64,), w2 (64,32), b2 (32,), w3 (32,1), b3 (1,).
    block_batch: rows per grid step (rounded up to a multiple of 128);
                 None = auto-size from the device's VMEM capacity.
    use_bf16: stream x / w1 / w2 (and h1) in bf16 with f32 accumulation.
    """
    w1, w2, w3 = params["w1"], params["w2"], params["w3"]
    b1, b2, b3 = params["b1"], params["b2"], params["b3"]

    B, input_dim = x.shape
    stream_dtype = jnp.bfloat16 if use_bf16 else jnp.float32

    x = x.astype(stream_dtype)
    w1 = w1.astype(stream_dtype)
    w2 = w2.astype(stream_dtype)
    w3_row = w3.reshape(1, -1).astype(jnp.float32)     # (1, 32): VPU projection row
    b1 = b1.reshape(1, -1).astype(jnp.float32)
    b2 = b2.reshape(1, -1).astype(jnp.float32)
    b3 = b3.reshape(1, 1).astype(jnp.float32)

    # ---- batch-tile selection (per-generation VMEM budget) -------------------
    x_itemsize = jnp.dtype(stream_dtype).itemsize
    vmem_cap = _vmem_capacity_bytes()
    b_aligned = _round_up(B, _ROW_ALIGN)

    if block_batch is None:
        # Double-buffered x stream gets ~1/4 of physical VMEM, capped at 8192 rows.
        tb = (vmem_cap // 4) // max(1, 2 * input_dim * x_itemsize)
        tb = max(_ROW_ALIGN, min(_MAX_TB, (tb // _ROW_ALIGN) * _ROW_ALIGN))
    else:
        tb = max(_ROW_ALIGN, _round_up(int(block_batch), _ROW_ALIGN))

    if b_aligned >= 2 * _ROW_ALIGN:
        # Keep >= 2 grid steps so the "parallel" axis can use both v7x TensorCores.
        tb = min(tb, _round_up(b_aligned // 2, _ROW_ALIGN))
    else:
        tb = b_aligned

    padded_b = _round_up(B, tb)
    if padded_b != B:
        x = jnp.pad(x, ((0, padded_b - B), (0, 0)))
    grid_n = padded_b // tb
    out_rows = tb // _ROW_ALIGN

    # ---- VMEM limit hint for the compiler -------------------------------------
    weight_bytes = sum(a.size * a.dtype.itemsize
                       for a in (w1, b1, w2, b2, w3_row, b3))
    per_step = (2 * tb * input_dim * x_itemsize          # x double buffer
                + 2 * tb * 4                             # output double buffer
                + 2 * weight_bytes                       # resident operands
                + tb * (64 + 32) * 4 + tb * 64 * x_itemsize)  # h1/h2 temporaries
    vmem_limit = int(min(vmem_cap * 9 // 10,
                         max(32 * 1024 * 1024, per_step * 3 // 2)))

    flops = 2 * padded_b * (input_dim * 64 + 64 * 32 + 32)
    bytes_accessed = x.size * x.dtype.itemsize + padded_b * 4 + weight_bytes

    # NOTE: for very small input_dim (e.g. 16) the x tile underfills the 128
    # lanes; packing several rows per lane-dense slab (with a restructured w1)
    # is a possible follow-up if xprof shows DMA-issue-rate as the binding
    # resource rather than per-step overhead / HBM bandwidth.
    out = pl.pallas_call(
        _mlp_kernel,
        out_shape=jax.ShapeDtypeStruct((grid_n, out_rows, _ROW_ALIGN), jnp.float32),
        grid=(grid_n,),
        in_specs=[
            pl.BlockSpec((tb, input_dim), lambda i: (i, 0)),   # x: streamed
            pl.BlockSpec(w1.shape, lambda i: (0, 0)),          # weights/biases:
            pl.BlockSpec(b1.shape, lambda i: (0, 0)),          # same block every
            pl.BlockSpec(w2.shape, lambda i: (0, 0)),          # step -> resident,
            pl.BlockSpec(b2.shape, lambda i: (0, 0)),          # no re-fetch
            pl.BlockSpec(w3_row.shape, lambda i: (0, 0)),
            pl.BlockSpec(b3.shape, lambda i: (0, 0)),
        ],
        out_specs=pl.BlockSpec((1, out_rows, _ROW_ALIGN), lambda i: (i, 0, 0)),
        compiler_params=pltpu.CompilerParams(
            dimension_semantics=("parallel",),
            vmem_limit_bytes=vmem_limit),
        cost_estimate=pl.CostEstimate(
            flops=flops, transcendentals=0, bytes_accessed=bytes_accessed),
    )(x, w1, b1, w2, b2, w3_row, b3)

    # Lane-dense slab -> (B, 1); padded rows are dropped here.
    return out.reshape(padded_b, 1)[:B]


def init_params(key, input_dim):
    """Deterministic init mirroring nn.Linear's U(-1/sqrt(fan_in), 1/sqrt(fan_in))."""
    dims = [(input_dim, 64), (64, 32), (32, 1)]
    params = {}
    for i, (fan_in, fan_out) in enumerate(dims, start=1):
        key, kw, kb = jax.random.split(key, 3)
        bound = 1.0 / (fan_in ** 0.5)
        params[f"w{i}"] = jax.random.uniform(
            kw, (fan_in, fan_out), jnp.float32, -bound, bound)
        params[f"b{i}"] = jax.random.uniform(
            kb, (fan_out,), jnp.float32, -bound, bound)
    return params


def _reference_forward(x, params):
    h1 = jnp.maximum(x @ params["w1"] + params["b1"], 0.0)
    h2 = jnp.maximum(h1 @ params["w2"] + params["b2"], 0.0)
    # precision="highest" so the 32->1 projection is exact f32, matching the
    # kernel's VPU reduction (layers 1/2 stay at default MXU precision, like
    # the kernel's MXU dots).
    return jnp.dot(h2, params["w3"], precision="highest") + params["b3"]


if __name__ == "__main__":
    key = jax.random.PRNGKey(0)
    key, kx = jax.random.split(key)

    batch, input_dim = 8, 16
    x = jax.random.normal(kx, (batch, input_dim), jnp.float32)
    params = init_params(key, input_dim)

    # 1) f32 path, tiny batch (padded to a single 128-row tile).
    out = jax.block_until_ready(payment_model_forward(x, params, use_bf16=False))
    ref = _reference_forward(x, params)
    assert out.shape == (batch, 1)
    assert jnp.allclose(out, ref, atol=1e-4, rtol=1e-4), "f32 single-tile mismatch"

    # 2) f32 path, multi-tile grid (auto tile keeps >= 2 steps; padding + slice).
    key, kx2 = jax.random.split(key)
    b2 = 300
    x2 = jax.random.normal(kx2, (b2, input_dim), jnp.float32)
    out2 = jax.block_until_ready(payment_model_forward(x2, params, use_bf16=False))
    ref2 = _reference_forward(x2, params)
    assert out2.shape == (b2, 1)
    assert jnp.allclose(out2, ref2, atol=1e-4, rtol=1e-4), "f32 multi-tile mismatch"

    # 3) Default path: bf16 streaming, user block_batch=100 rounded up to 128
    #    (3-step grid).  Loose tolerance: h1 is rounded to bf16 between layers.
    out3 = jax.block_until_ready(
        payment_model_forward(x2, params, block_batch=100))
    assert out3.shape == (b2, 1)
    assert jnp.allclose(out3, ref2, atol=5e-2, rtol=5e-2), "bf16 path mismatch"

    print("KERNEL_OK")
</pallas_src>

<mosaic_0001>
module attributes {stable_mosaic.version = 11 : i64} {
  func.func @_mlp_kernel(%arg0: i32, %arg1: memref<128x16xf32, #tpu.memory_space<vmem>>, %arg2: memref<16x64xf32, #tpu.memory_space<vmem>>, %arg3: memref<1x64xf32, #tpu.memory_space<vmem>>, %arg4: memref<64x32xf32, #tpu.memory_space<vmem>>, %arg5: memref<1x32xf32, #tpu.memory_space<vmem>>, %arg6: memref<1x32xf32, #tpu.memory_space<vmem>>, %arg7: memref<1x1xf32, #tpu.memory_space<vmem>>, %arg8: memref<1x1x128xf32, #tpu.memory_space<vmem>>) attributes {dimension_semantics = [#tpu.dimension_semantics<parallel>], iteration_bounds = array<i64: 1>, scalar_prefetch = 0 : i64, scratch_operands = 0 : i64, tpu.core_type = #tpu.core_type<tc>, window_params = [{transform_indices = @transform_0, window_bounds = array<i64: 128, 16>}, {pipeline_mode = #tpu.pipeline_mode<synchronous>, transform_indices = @transform_1, window_bounds = array<i64: 16, 64>}, {pipeline_mode = #tpu.pipeline_mode<synchronous>, transform_indices = @transform_2, window_bounds = array<i64: 1, 64>}, {pipeline_mode = #tpu.pipeline_mode<synchronous>, transform_indices = @transform_3, window_bounds = array<i64: 64, 32>}, {pipeline_mode = #tpu.pipeline_mode<synchronous>, transform_indices = @transform_4, window_bounds = array<i64: 1, 32>}, {pipeline_mode = #tpu.pipeline_mode<synchronous>, transform_indices = @transform_5, window_bounds = array<i64: 1, 32>}, {pipeline_mode = #tpu.pipeline_mode<synchronous>, transform_indices = @transform_6, window_bounds = array<i64: 1, 1>}, {transform_indices = @transform_7, window_bounds = array<i64: 1, 1, 128>}]} {
    %c0 = arith.constant 0 : index
    %c0_0 = arith.constant 0 : index
    %0 = vector.load %arg1[%c0, %c0_0] : memref<128x16xf32, #tpu.memory_space<vmem>>, vector<128x16xf32>
    %c0_1 = arith.constant 0 : index
    %c0_2 = arith.constant 0 : index
    %1 = vector.load %arg2[%c0_1, %c0_2] : memref<16x64xf32, #tpu.memory_space<vmem>>, vector<16x64xf32>
    %cst = arith.constant dense<0.000000e+00> : vector<128x64xf32>
    %2 = tpu.matmul %0, %1, %cst {dimension_numbers = #tpu.dot_dimension_numbers<[1], [0], [0], [1], [0, 0, 1, 1], [], []>} : vector<128x16xf32>, vector<16x64xf32>, vector<128x64xf32> -> vector<128x64xf32>
    %c0_3 = arith.constant 0 : index
    %c0_4 = arith.constant 0 : index
    %3 = vector.load %arg3[%c0_3, %c0_4] : memref<1x64xf32, #tpu.memory_space<vmem>>, vector<1x64xf32>
    %4 = vector.broadcast %3 : vector<1x64xf32> to vector<128x64xf32>
    %5 = arith.addf %2, %4 : vector<128x64xf32>
    %cst_5 = arith.constant 0.000000e+00 : f32
    %6 = vector.broadcast %cst_5 : f32 to vector<128x64xf32>
    %7 = arith.maximumf %5, %6 : vector<128x64xf32>
    %c0_6 = arith.constant 0 : index
    %c0_7 = arith.constant 0 : index
    %8 = vector.load %arg4[%c0_6, %c0_7] : memref<64x32xf32, #tpu.memory_space<vmem>>, vector<64x32xf32>
    %cst_8 = arith.constant dense<0.000000e+00> : vector<128x32xf32>
    %9 = tpu.matmul %7, %8, %cst_8 {dimension_numbers = #tpu.dot_dimension_numbers<[1], [0], [0], [1], [0, 0, 1, 1], [], []>} : vector<128x64xf32>, vector<64x32xf32>, vector<128x32xf32> -> vector<128x32xf32>
    %c0_9 = arith.constant 0 : index
    %c0_10 = arith.constant 0 : index
    %10 = vector.load %arg5[%c0_9, %c0_10] : memref<1x32xf32, #tpu.memory_space<vmem>>, vector<1x32xf32>
    %11 = vector.broadcast %10 : vector<1x32xf32> to vector<128x32xf32>
    %12 = arith.addf %9, %11 : vector<128x32xf32>
    %cst_11 = arith.constant 0.000000e+00 : f32
    %13 = vector.broadcast %cst_11 : f32 to vector<128x32xf32>
    %14 = arith.maximumf %12, %13 : vector<128x32xf32>
    %15 = vector.shape_cast %14 : vector<128x32xf32> to vector<1x128x32xf32>
    %c0_12 = arith.constant 0 : index
    %c0_13 = arith.constant 0 : index
    %16 = vector.load %arg6[%c0_12, %c0_13] : memref<1x32xf32, #tpu.memory_space<vmem>>, vector<1x32xf32>
    %17 = vector.shape_cast %16 : vector<1x32xf32> to vector<1x1x32xf32>
    %18 = vector.broadcast %17 : vector<1x1x32xf32> to vector<1x128x32xf32>
    %19 = arith.mulf %15, %18 : vector<1x128x32xf32>
    %cst_14 = arith.constant dense<0.000000e+00> : vector<1x128xf32>
    %20 = vector.multi_reduction <add>, %19, %cst_14 [2] : vector<1x128x32xf32> to vector<1x128xf32>
    %c0_15 = arith.constant 0 : index
    %c0_16 = arith.constant 0 : index
    %21 = vector.load %arg7[%c0_15, %c0_16] : memref<1x1xf32, #tpu.memory_space<vmem>>, vector<1x1xf32>
    %22 = vector.broadcast %21 : vector<1x1xf32> to vector<1x128xf32>
    %23 = arith.addf %20, %22 : vector<1x128xf32>
    %24 = vector.shape_cast %23 : vector<1x128xf32> to vector<1x1x128xf32>
    %c0_17 = arith.constant 0 : index
    %c0_18 = arith.constant 0 : index
    %c0_19 = arith.constant 0 : index
    %25 = vector.load %arg8[%c0_17, %c0_18, %c0_19] : memref<1x1x128xf32, #tpu.memory_space<vmem>>, vector<1x1x128xf32>
    tpu.vector_store %arg8[%c0_17, %c0_18, %c0_19], %24 {strides = array<i32>} : memref<1x1x128xf32, #tpu.memory_space<vmem>>, vector<1x1x128xf32>,
    return
  }
  func.func @transform_0(%arg0: i32) -> (i32, i32) {
    %c0_i32 = arith.constant 0 : i32
    %c0_i32_0 = arith.constant 0 : i32
    return %arg0, %c0_i32 : i32, i32
  }
  func.func @transform_1(%arg0: i32) -> (i32, i32) {
    %c0_i32 = arith.constant 0 : i32
    %c0_i32_0 = arith.constant 0 : i32
    %c0_i32_1 = arith.constant 0 : i32
    return %c0_i32, %c0_i32_0 : i32, i32
  }
  func.func @transform_2(%arg0: i32) -> (i32, i32) {
    %c0_i32 = arith.constant 0 : i32
    %c0_i32_0 = arith.constant 0 : i32
    %c0_i32_1 = arith.constant 0 : i32
    return %c0_i32, %c0_i32_0 : i32, i32
  }
  func.func @transform_3(%arg0: i32) -> (i32, i32) {
    %c0_i32 = arith.constant 0 : i32
    %c0_i32_0 = arith.constant 0 : i32
    %c0_i32_1 = arith.constant 0 : i32
    return %c0_i32, %c0_i32_0 : i32, i32
  }
  func.func @transform_4(%arg0: i32) -> (i32, i32) {
    %c0_i32 = arith.constant 0 : i32
    %c0_i32_0 = arith.constant 0 : i32
    %c0_i32_1 = arith.constant 0 : i32
    return %c0_i32, %c0_i32_0 : i32, i32
  }
  func.func @transform_5(%arg0: i32) -> (i32, i32) {
    %c0_i32 = arith.constant 0 : i32
    %c0_i32_0 = arith.constant 0 : i32
    %c0_i32_1 = arith.constant 0 : i32
    return %c0_i32, %c0_i32_0 : i32, i32
  }
  func.func @transform_6(%arg0: i32) -> (i32, i32) {
    %c0_i32 = arith.constant 0 : i32
    %c0_i32_0 = arith.constant 0 : i32
    %c0_i32_1 = arith.constant 0 : i32
    return %c0_i32, %c0_i32_0 : i32, i32
  }
  func.func @transform_7(%arg0: i32) -> (i32, i32, i32) {
    %c0_i32 = arith.constant 0 : i32
    %c0_i32_0 = arith.constant 0 : i32
    %c0_i32_1 = arith.constant 0 : i32
    return %arg0, %c0_i32, %c0_i32_0 : i32, i32, i32
  }
}

</mosaic_0001>

<bundles_post_ra>
// kernel: tpu_custom_call.1
= control target key start
LH: loop header
LB: loop body
LE: loop exit
PB: predicated region body
PF: predicated region fallthrough
CT: control target
= control target key end

     0   :  { %s866_s0 = inlined_call_operand.vmem [shape: f32[128,16], index: 0, kind: input, shape index: {}]   ;;  %s867_s1 = inlined_call_operand.vmem [shape: f32[16,64], index: 1, kind: input, shape index: {}]   ;;  %s868_s2 = inlined_call_operand.vmem [shape: f32[1,64], index: 2, kind: input, shape index: {}]   ;;  %s869_s3 = inlined_call_operand.vmem [shape: f32[64,32], index: 3, kind: input, shape index: {}]   ;;  %s870_s4 = inlined_call_operand.vmem [shape: f32[1,32], index: 4, kind: input, shape index: {}]   ;;  %s871_s5 = inlined_call_operand.vmem [shape: f32[1,32], index: 5, kind: input, shape index: {}]   ;;  %s872_s6 = inlined_call_operand.<no memory space> [shape: f32[1,1], index: 6, kind: input, shape index: {}]   ;;  %s873_s7 = inlined_call_operand.hbm [shape: f32[1,1,128], index: 7, kind: output, shape index: {}]  }
   0x1   :  { %v12_v0 = vstv %s872_s6 }
   0x2   :  { %13 = vst [vmem:[#allocation2] sm:$0x1] %v12_v0 }
   0x3   :  { %v46_v1 = vld [vmem:[%s867_s1 + $0x8] sm:$0xff]  ;;  %v45_v2 = vld [vmem:[%s867_s1] sm:$0xff]  ;;  %vm51_vm0 = vcmask 130048  }
   0x4   :  { %114 = vmatpush.msra.mxu0 %v46_v1  ;;  %v29_v3 = vld [vmem:[%s866_s0] sm:$0xff]  ;;  %544 = vmatpush.msra.mxu3 %v46_v1 }
   0x6   :  { %115 = vmatpush.msra.mxu0 %v45_v2  ;;  %545 = vmatpush.msra.mxu3 %v45_v2 }
   0x7   :  { %14 = vsyncpa [#allocation4], 0  ;;  %512 = vmatmul.msk.f32.vlgmr.msra.gmra.mxu0 %vm51_vm0, %v29_v3  ;;  %v30_v4 = vld [vmem:[%s866_s0 + $0x8] sm:$0xff]  ;;  %v31_v5 = vld [vmem:[%s866_s0 + $0x10] sm:$0xff]  ;;  %vm193_vm1 = vcmask 523264   ;;  %v586_v54 = vmov 0  }
   0x8   :  { %v32_v6 = vld [vmem:[%s866_s0 + $0x18] sm:$0xff]  ;;  %v33_v7 = vld [vmem:[%s866_s0 + $0x20] sm:$0xff]  ;;  %v38_v8 = vld [vmem:[%s866_s0 + $0x48] sm:$0xff]  ;;  %556 = vset.pattern.permute.xlu0 %v586_v54  ;;  %vm343_vm2 = vcmask 261120   ;;  %vm436_vm3 = vcmask 130112   ;;  %vm440_vm4 = vcmask 195712  }
   0x9   :  { %521 = vmatmul.msk.f32.vlgmr.msra.gmra.mxu3 %vm51_vm0, %v38_v8  ;;  %v34_v9 = vld [vmem:[%s866_s0 + $0x28] sm:$0xff]  ;;  %v39_v10 = vld [vmem:[%s866_s0 + $0x50] sm:$0xff]  ;;  %v40_v12 = vld [vmem:[%s866_s0 + $0x58] sm:$0xff]  ;;  %vm444_vm5 = vcmask 261312   ;;  %vm448_vm6 = vcmask 326912   ;;  %vm452_vm7 = vcmask 392512  }
   0xa   :  { %v35_v11 = vld [vmem:[%s866_s0 + $0x30] sm:$0xff]  ;;  %v188_v13 = vld [vmem:[%s869_s3 + $0x38] sm:$0xff]  ;;  %v186_v15 = vld [vmem:[%s869_s3 + $0x28] sm:$0xff]  ;;  %vm456_vm8 = vcmask 458112   ;;  %vm460_vm9 = vcmask 523712   ;;  %vm464_vm10 = vcmask 589312  }
   0xb   :  { %v187_v14 = vld [vmem:[%s869_s3 + $0x30] sm:$0xff]  ;;  %250 = vmatpush.msra.mxu1 %v188_v13  ;;  %546 = vmatpush.msra.mxu2 %v188_v13  ;;  %v36_v16 = vld [vmem:[%s866_s0 + $0x38] sm:$0xff]  ;;  %v185_v17 = vld [vmem:[%s869_s3 + $0x20] sm:$0xff]  ;;  %vm468_vm11 = vcmask 654912   ;;  %vm472_vm12 = vcmask 720512   ;;  %vm476_vm13 = vcmask 786112  }
   0xc   :  { %v41_v18 = vld [vmem:[%s866_s0 + $0x60] sm:$0xff]  ;;  %v184_v19 = vld [vmem:[%s869_s3 + $0x18] sm:$0xff]  ;;  %v42_v21 = vld [vmem:[%s866_s0 + $0x68] sm:$0xff]  ;;  %vm480_vm14 = vcmask 851712   ;;  %vm484_vm15 = vcmask 917312   ;;  %s503_s9 = sshll.u32 %s873_s7, 4  ;;  %s504_s9 = int_to_ptr.hbm [resolvable:$true] %s503_s9 }
   0xd   :  { %251 = vmatpush.msra.mxu1 %v187_v14  ;;  %547 = vmatpush.msra.mxu2 %v187_v14  ;;  %v37_v20 = vld [vmem:[%s866_s0 + $0x40] sm:$0xff]  ;;  %v43_v22 = vld [vmem:[%s866_s0 + $0x70] sm:$0xff]  ;;  %v44_v23 = vld [vmem:[%s866_s0 + $0x78] sm:$0xff] }
   0xe   :  { %v183_v24 = vld [vmem:[%s869_s3 + $0x10] sm:$0xff]  ;;  %v182_v25 = vld [vmem:[%s869_s3 + $0x8] sm:$0xff]  ;;  %v181_v26 = vld [vmem:[%s869_s3] sm:$0xff] }
   0xf   :  { %513 = vmatmul.msk.f32.gmra.mxu0 %vm51_vm0, %v30_v4  ;;  %252 = vmatpush.msra.mxu1 %v186_v15  ;;  %v728_v27 = vld [vmem:[%s868_s2] ss:$0 sm:$0xff] }
  0x10   :  { %548 = vmatpush.msra.mxu2 %v186_v15  ;;  %v392_v53 = vld [vmem:[#allocation2] sm:$0x1] }
  0x11   :  { %522 = vmatmul.msk.f32.gmra.mxu3 %vm51_vm0, %v39_v10  ;;  %253 = vmatpush.msra.mxu1 %v185_v17  ;;  %v765_v14 = vld [vmem:[%s870_s4] ss:$0 sm:$0xff]  ;;  %s587_s4 = smov [#allocation3]  }
  0x12   :  { %549 = vmatpush.msra.mxu2 %v185_v17  ;;  %395 = vperm.xlu0 %556, %v392_v53   ;;  %v771_v17 = vld [vmem:[%s871_s5] ss:$0 sm:$0xff]  ;;  %s501_s5 = sshll.u32 %s587_s4, 4  ;;  %s502_s5 = int_to_ptr.vmem [resolvable:$true] %s501_s5 }
  0x13   :  { %254 = vmatpush.msra.mxu1 %v184_v19 }
  0x14   :  { %550 = vmatpush.msra.mxu2 %v184_v19 }
  0x15   :  { %255 = vmatpush.msra.mxu1 %v183_v24 }
  0x16   :  { %551 = vmatpush.msra.mxu2 %v183_v24 }
  0x17   :  { %514 = vmatmul.msk.f32.gmra.mxu0 %vm51_vm0, %v31_v5  ;;  %256 = vmatpush.msra.mxu1 %v182_v25 }
  0x18   :  { %552 = vmatpush.msra.mxu2 %v182_v25 }
  0x19   :  { %523 = vmatmul.msk.f32.gmra.mxu3 %vm51_vm0, %v40_v12  ;;  %257 = vmatpush.msra.mxu1 %v181_v26 }
  0x1a   :  { %553 = vmatpush.msra.mxu2 %v181_v26 }
  0x1f   :  { %515 = vmatmul.msk.f32.gmra.mxu0 %vm51_vm0, %v32_v6 }
  0x21   :  { %524 = vmatmul.msk.f32.gmra.mxu3 %vm51_vm0, %v41_v18 }
  0x27   :  { %516 = vmatmul.msk.f32.gmra.mxu0 %vm51_vm0, %v33_v7 }
  0x29   :  { %525 = vmatmul.msk.f32.gmra.mxu3 %vm51_vm0, %v42_v21 }
  0x2f   :  { %517 = vmatmul.msk.f32.gmra.mxu0 %vm51_vm0, %v34_v9 }
  0x31   :  { %526 = vmatmul.msk.f32.gmra.mxu3 %vm51_vm0, %v43_v22 }
  0x37   :  { %518 = vmatmul.msk.f32.gmra.mxu0 %vm51_vm0, %v35_v11 }
  0x39   :  { %527 = vmatmul.msk.f32.gmra.mxu3 %vm51_vm0, %v44_v23 }
  0x3f   :  { %519 = vmatmul.msk.f32.gmra.mxu0 %vm51_vm0, %v36_v16 }
  0x47   :  { %520 = vmatmul.msk.f32.gmra.mxu0 %vm51_vm0, %v37_v20  ;;  %vm488_vm0 = vcmask 982912  }
  0x84   :  { %v117_v28 = vpop.f32.mrf.mxu0 }
  0x85   :  { %v118_v29 = vadd.f32 %v728_v27, %v117_v28 }
  0x87   :  { %v165_v30 = vmax.f32 %v118_v29, 0.0 }
  0x89   :  { %528 = vmatmul.msk.f32.vlgmr.msra.gmra.mxu1 %vm193_vm1, %v165_v30 }
  0x8c   :  { %v120_v31 = vpop.f32.mrf.mxu0  ;;  %v144_v49 = vpop.f32.mrf.mxu3 }
  0x8d   :  { %v121_v32 = vadd.f32 %v728_v27, %v120_v31  ;;  %v145_v59 = vadd.f32 %v728_v27, %v144_v49 }
  0x8f   :  { %v166_v33 = vmax.f32 %v121_v32, 0.0  ;;  %v174_v60 = vmax.f32 %v145_v59, 0.0 }
  0x91   :  { %529 = vmatmul.msk.f32.gmra.mxu1 %vm193_vm1, %v166_v33 }
  0x94   :  { %v123_v34 = vpop.f32.mrf.mxu0  ;;  %v147_v56 = vpop.f32.mrf.mxu3 }
  0x95   :  { %v124_v35 = vadd.f32 %v728_v27, %v123_v34  ;;  %v148_v62 = vadd.f32 %v728_v27, %v147_v56 }
  0x97   :  { %v167_v36 = vmax.f32 %v124_v35, 0.0  ;;  %v175_v63 = vmax.f32 %v148_v62, 0.0 }
  0x99   :  { %530 = vmatmul.msk.f32.gmra.mxu1 %vm193_vm1, %v167_v36 }
  0x9c   :  { %v126_v37 = vpop.f32.mrf.mxu0  ;;  %v150_v61 = vpop.f32.mrf.mxu3 }
  0x9d   :  { %v127_v38 = vadd.f32 %v728_v27, %v126_v37  ;;  %v151_v1 = vadd.f32 %v728_v27, %v150_v61 }
  0x9f   :  { %v168_v39 = vmax.f32 %v127_v38, 0.0  ;;  %v176_v2 = vmax.f32 %v151_v1, 0.0 }
  0xa1   :  { %531 = vmatmul.msk.f32.gmra.mxu1 %vm193_vm1, %v168_v39 }
  0xa4   :  { %v129_v40 = vpop.f32.mrf.mxu0  ;;  %v153_v0 = vpop.f32.mrf.mxu3 }
  0xa5   :  { %v130_v41 = vadd.f32 %v728_v27, %v129_v40  ;;  %v154_v3 = vadd.f32 %v728_v27, %v153_v0 }
  0xa7   :  { %v169_v42 = vmax.f32 %v130_v41, 0.0  ;;  %v177_v5 = vmax.f32 %v154_v3, 0.0 }
  0xa9   :  { %532 = vmatmul.msk.f32.gmra.mxu1 %vm193_vm1, %v169_v42 }
  0xac   :  { %v132_v43 = vpop.f32.mrf.mxu0  ;;  %v156_v4 = vpop.f32.mrf.mxu3 }
  0xad   :  { %v133_v44 = vadd.f32 %v728_v27, %v132_v43  ;;  %v157_v6 = vadd.f32 %v728_v27, %v156_v4 }
  0xaf   :  { %v170_v45 = vmax.f32 %v133_v44, 0.0  ;;  %v178_v8 = vmax.f32 %v157_v6, 0.0 }
  0xb1   :  { %533 = vmatmul.msk.f32.gmra.mxu1 %vm193_vm1, %v170_v45 }
  0xb4   :  { %v135_v46 = vpop.f32.mrf.mxu0  ;;  %v159_v7 = vpop.f32.mrf.mxu3 }
  0xb5   :  { %v136_v47 = vadd.f32 %v728_v27, %v135_v46  ;;  %v160_v9 = vadd.f32 %v728_v27, %v159_v7 }
  0xb7   :  { %v171_v48 = vmax.f32 %v136_v47, 0.0  ;;  %v179_v10 = vmax.f32 %v160_v9, 0.0 }
  0xb9   :  { %534 = vmatmul.msk.f32.gmra.mxu1 %vm193_vm1, %v171_v48 }
  0xbc   :  { %v138_v50 = vpop.f32.mrf.mxu0  ;;  %v162_v11 = vpop.f32.mrf.mxu3 }
  0xbd   :  { %v139_v51 = vadd.f32 %v728_v27, %v138_v50  ;;  %v163_v12 = vadd.f32 %v728_v27, %v162_v11 }
  0xbf   :  { %v172_v52 = vmax.f32 %v139_v51, 0.0  ;;  %v180_v13 = vmax.f32 %v163_v12, 0.0 }
  0xc1   :  { %535 = vmatmul.msk.f32.gmra.mxu1 %vm193_vm1, %v172_v52 }
  0xc4   :  { %v141_v55 = vpop.f32.mrf.mxu0 }
  0xc5   :  { %v142_v57 = vadd.f32 %v728_v27, %v141_v55 }
  0xc7   :  { %v173_v58 = vmax.f32 %v142_v57, 0.0 }
  0xc9   :  { %536 = vmatmul.msk.f32.vlgmr.msra.gmra.mxu2 %vm193_vm1, %v173_v58 }
  0xd1   :  { %537 = vmatmul.msk.f32.gmra.mxu2 %vm193_vm1, %v174_v60 }
  0xd9   :  { %538 = vmatmul.msk.f32.gmra.mxu2 %vm193_vm1, %v175_v63 }
  0xe1   :  { %539 = vmatmul.msk.f32.gmra.mxu2 %vm193_vm1, %v176_v2 }
  0xe9   :  { %540 = vmatmul.msk.f32.gmra.mxu2 %vm193_vm1, %v177_v5 }
  0xf1   :  { %541 = vmatmul.msk.f32.gmra.mxu2 %vm193_vm1, %v178_v8 }
  0xf9   :  { %542 = vmatmul.msk.f32.gmra.mxu2 %vm193_vm1, %v179_v10 }
 0x101   :  { %543 = vmatmul.msk.f32.gmra.mxu2 %vm193_vm1, %v180_v13  ;;  %vm492_vm1 = vcmask 1048512  }
 0x106   :  { %v259_v15 = vpop.f32.mrf.mxu1 }
 0x107   :  { %v260_v16 = vadd.f32 %v765_v14, %v259_v15 }
 0x109   :  { %v307_v18 = vmax.f32 %v260_v16, 0.0 }
 0x10b   :  { %v327_v19 = vmul.f32 %v771_v17, %v307_v18 }
 0x10d   :  { %v344_v20 = vsel %vm343_vm2, %v327_v19, 0.0 }
 0x10e   :  { %v262_v21 = vpop.f32.mrf.mxu1  ;;  %345 = vadd.xlane.f32.xlu0 %v344_v20 }
 0x10f   :  { %v263_v22 = vadd.f32 %v765_v14, %v262_v21 }
 0x111   :  { %v308_v23 = vmax.f32 %v263_v22, 0.0 }
 0x113   :  { %v328_v24 = vmul.f32 %v771_v17, %v308_v23 }
 0x115   :  { %v347_v25 = vsel %vm343_vm2, %v328_v24, 0.0 }
 0x116   :  { %v265_v26 = vpop.f32.mrf.mxu1  ;;  %348 = vadd.xlane.f32.xlu1 %v347_v25 }
 0x117   :  { %v266_v27 = vadd.f32 %v765_v14, %v265_v26 }
 0x119   :  { %v309_v28 = vmax.f32 %v266_v27, 0.0 }
 0x11b   :  { %v329_v29 = vmul.f32 %v771_v17, %v309_v28 }
 0x11d   :  { %v350_v30 = vsel %vm343_vm2, %v329_v29, 0.0 }
 0x11e   :  { %v268_v31 = vpop.f32.mrf.mxu1  ;;  %351 = vadd.xlane.f32.xlu1 %v350_v30 }
 0x11f   :  { %v269_v32 = vadd.f32 %v765_v14, %v268_v31 }
 0x121   :  { %v310_v33 = vmax.f32 %v269_v32, 0.0 }
 0x123   :  { %v330_v34 = vmul.f32 %v771_v17, %v310_v33 }
 0x125   :  { %v353_v35 = vsel %vm343_vm2, %v330_v34, 0.0 }
 0x126   :  { %v271_v36 = vpop.f32.mrf.mxu1  ;;  %354 = vadd.xlane.f32.xlu2 %v353_v35 }
 0x127   :  { %v272_v37 = vadd.f32 %v765_v14, %v271_v36 }
 0x129   :  { %v311_v38 = vmax.f32 %v272_v37, 0.0 }
 0x12b   :  { %v331_v39 = vmul.f32 %v771_v17, %v311_v38 }
 0x12d   :  { %v356_v40 = vsel %vm343_vm2, %v331_v39, 0.0 }
 0x12e   :  { %v274_v41 = vpop.f32.mrf.mxu1  ;;  %357 = vadd.xlane.f32.xlu2 %v356_v40 }
 0x12f   :  { %v275_v42 = vadd.f32 %v765_v14, %v274_v41  ;;  %v396_v41 = vpop.permute.xlu0 %395 }
 0x131   :  { %v312_v43 = vmax.f32 %v275_v42, 0.0 }
 0x133   :  { %v332_v44 = vmul.f32 %v771_v17, %v312_v43  ;;  %v431_v43 = vlaneseq }
 0x135   :  { %v359_v45 = vsel %vm343_vm2, %v332_v44, 0.0 }
 0x136   :  { %v277_v46 = vpop.f32.mrf.mxu1  ;;  %360 = vadd.xlane.f32.xlu1 %v359_v45 }
 0x137   :  { %v278_v47 = vadd.f32 %v765_v14, %v277_v46  ;;  %v820_v46 = vperm.slane %v396_v41, 0 }
 0x139   :  { %v313_v48 = vmax.f32 %v278_v47, 0.0 }
 0x13b   :  { %v333_v49 = vmul.f32 %v771_v17, %v313_v48 }
 0x13d   :  { %v362_v50 = vsel %vm343_vm2, %v333_v49, 0.0 }
 0x13e   :  { %v280_v51 = vpop.f32.mrf.mxu1  ;;  %363 = vadd.xlane.f32.xlu2 %v362_v50 }
 0x13f   :  { %v281_v52 = vadd.f32 %v765_v14, %v280_v51 }
 0x141   :  { %v314_v53 = vmax.f32 %v281_v52, 0.0 }
 0x143   :  { %v334_v54 = vmul.f32 %v771_v17, %v314_v53 }
 0x145   :  { %v365_v55 = vsel %vm343_vm2, %v334_v54, 0.0 }
 0x146   :  { %366 = vadd.xlane.f32.xlu1 %v365_v55 }
 0x14c   :  { %v283_v56 = vpop.f32.mrf.mxu2 }
 0x14d   :  { %v284_v57 = vadd.f32 %v765_v14, %v283_v56 }
 0x14f   :  { %v315_v58 = vmax.f32 %v284_v57, 0.0 }
 0x151   :  { %v335_v59 = vmul.f32 %v771_v17, %v315_v58 }
 0x153   :  { %v368_v60 = vsel %vm343_vm2, %v335_v59, 0.0 }
 0x154   :  { %v286_v61 = vpop.f32.mrf.mxu2  ;;  %369 = vadd.xlane.f32.xlu2 %v368_v60 }
 0x155   :  { %v287_v62 = vadd.f32 %v765_v14, %v286_v61 }
 0x157   :  { %v316_v63 = vmax.f32 %v287_v62, 0.0 }
 0x159   :  { %v336_v0 = vmul.f32 %v771_v17, %v316_v63 }
 0x15b   :  { %v371_v1 = vsel %vm343_vm2, %v336_v0, 0.0 }
 0x15c   :  { %v289_v2 = vpop.f32.mrf.mxu2  ;;  %372 = vadd.xlane.f32.xlu1 %v371_v1 }
 0x15d   :  { %v290_v3 = vadd.f32 %v765_v14, %v289_v2 }
 0x15f   :  { %v317_v4 = vmax.f32 %v290_v3, 0.0 }
 0x161   :  { %v337_v5 = vmul.f32 %v771_v17, %v317_v4 }
 0x163   :  { %v374_v6 = vsel %vm343_vm2, %v337_v5, 0.0 }
 0x164   :  { %v292_v7 = vpop.f32.mrf.mxu2  ;;  %375 = vadd.xlane.f32.xlu2 %v374_v6 }
 0x165   :  { %v293_v8 = vadd.f32 %v765_v14, %v292_v7 }
 0x167   :  { %v318_v9 = vmax.f32 %v293_v8, 0.0 }
 0x169   :  { %v338_v10 = vmul.f32 %v771_v17, %v318_v9 }
 0x16b   :  { %v377_v11 = vsel %vm343_vm2, %v338_v10, 0.0 }
 0x16c   :  { %v295_v12 = vpop.f32.mrf.mxu2  ;;  %378 = vadd.xlane.f32.xlu1 %v377_v11 }
 0x16d   :  { %v296_v13 = vadd.f32 %v765_v14, %v295_v12 }
 0x16f   :  { %v319_v15 = vmax.f32 %v296_v13, 0.0 }
 0x171   :  { %v339_v16 = vmul.f32 %v771_v17, %v319_v15 }
 0x173   :  { %v380_v18 = vsel %vm343_vm2, %v339_v16, 0.0 }
 0x174   :  { %v298_v19 = vpop.f32.mrf.mxu2  ;;  %381 = vadd.xlane.f32.xlu2 %v380_v18 }
 0x175   :  { %v299_v20 = vadd.f32 %v765_v14, %v298_v19 }
 0x177   :  { %v320_v21 = vmax.f32 %v299_v20, 0.0 }
 0x179   :  { %v340_v22 = vmul.f32 %v771_v17, %v320_v21 }
 0x17b   :  { %v383_v23 = vsel %vm343_vm2, %v340_v22, 0.0 }
 0x17c   :  { %v301_v24 = vpop.f32.mrf.mxu2  ;;  %384 = vadd.xlane.f32.xlu1 %v383_v23 }
 0x17d   :  { %v302_v25 = vadd.f32 %v765_v14, %v301_v24 }
 0x17f   :  { %v321_v26 = vmax.f32 %v302_v25, 0.0 }
 0x181   :  { %v341_v27 = vmul.f32 %v771_v17, %v321_v26 }
 0x183   :  { %v386_v28 = vsel %vm343_vm2, %v341_v27, 0.0 }
 0x184   :  { %v304_v29 = vpop.f32.mrf.mxu2  ;;  %387 = vadd.xlane.f32.xlu2 %v386_v28 }
 0x185   :  { %v305_v30 = vadd.f32 %v765_v14, %v304_v29  ;;  %v822_v14 = vand.u32 127, %v431_v43 }
 0x187   :  { %v322_v31 = vmax.f32 %v305_v30, 0.0  ;;  %v434_v47 = vadd.s32 4294967288, %v822_v14  ;;  %v438_v50 = vadd.s32 4294967280, %v822_v14  ;;  %v442_v52 = vadd.s32 4294967272, %v822_v14 }
 0x188   :  { %v446_v56 = vadd.s32 4294967264, %v822_v14  ;;  %v450_v62 = vadd.s32 4294967256, %v822_v14  ;;  %v454_v1 = vadd.s32 4294967248, %v822_v14  ;;  %v458_v4 = vadd.s32 4294967240, %v822_v14 }
 0x189   :  { %v342_v32 = vmul.f32 %v771_v17, %v322_v31  ;;  %v349_v34 = vpop.xlane.xlu1 %348  ;;  %v346_v17 = vpop.xlane.xlu0 %345  ;;  %v462_v7 = vadd.s32 4294967232, %v822_v14  ;;  %v466_v11 = vadd.s32 4294967224, %v822_v14  ;;  %v470_v15 = vadd.s32 4294967216, %v822_v14 }
 0x18a   :  { %v400_v48 = vadd.f32 %v820_v46, %v349_v34  ;;  %v399_v49 = vadd.f32 %v820_v46, %v346_v17  ;;  %v474_v21 = vadd.s32 4294967208, %v822_v14  ;;  %v478_v25 = vadd.s32 4294967200, %v822_v14 }
 0x18b   :  { %v389_v33 = vsel %vm343_vm2, %v342_v32, 0.0  ;;  %v482_v29 = vadd.s32 4294967192, %v822_v14  ;;  %v490_v41 = vadd.s32 4294967176, %v822_v14 }
 0x18c   :  { %390 = vadd.xlane.f32.xlu0 %v389_v33  ;;  %v435_v54 = vperm.slane %v400_v48, %v434_v47  ;;  %v433_v59 = vperm.slane %v399_v49, %v822_v14  ;;  %v486_v33 = vadd.s32 4294967184, %v822_v14 }
 0x18e   :  { %v437_v0 = vsel %vm436_vm3, %v435_v54, %v433_v59 }
 0x191   :  { %v352_v36 = vpop.xlane.xlu1 %351 }
 0x192   :  { %v401_v51 = vadd.f32 %v820_v46, %v352_v36 }
 0x194   :  { %v439_v60 = vperm.slane %v401_v51, %v438_v50 }
 0x196   :  { %v441_v6 = vsel %vm440_vm4, %v439_v60, %v437_v0 }
 0x199   :  { %v355_v35 = vpop.xlane.xlu2 %354 }
 0x19a   :  { %v402_v53 = vadd.f32 %v820_v46, %v355_v35 }
 0x19c   :  { %v443_v61 = vperm.slane %v402_v53, %v442_v52 }
 0x19e   :  { %v445_v9 = vsel %vm444_vm5, %v443_v61, %v441_v6 }
 0x1a1   :  { %v358_v37 = vpop.xlane.xlu2 %357 }
 0x1a2   :  { %v403_v57 = vadd.f32 %v820_v46, %v358_v37 }
 0x1a4   :  { %v447_v3 = vperm.slane %v403_v57, %v446_v56 }
 0x1a6   :  { %v449_v19 = vsel %vm448_vm6, %v447_v3, %v445_v9 }
 0x1a9   :  { %v361_v38 = vpop.xlane.xlu1 %360 }
 0x1aa   :  { %v404_v63 = vadd.f32 %v820_v46, %v361_v38 }
 0x1ac   :  { %v451_v10 = vperm.slane %v404_v63, %v450_v62 }
 0x1ae   :  { %v453_v27 = vsel %vm452_vm7, %v451_v10, %v449_v19 }
 0x1b1   :  { %v364_v39 = vpop.xlane.xlu2 %363 }
 0x1b2   :  { %v405_v2 = vadd.f32 %v820_v46, %v364_v39 }
 0x1b4   :  { %v455_v13 = vperm.slane %v405_v2, %v454_v1 }
 0x1b6   :  { %v457_v31 = vsel %vm456_vm8, %v455_v13, %v453_v27 }
 0x1b9   :  { %v367_v40 = vpop.xlane.xlu1 %366 }
 0x1ba   :  { %v406_v5 = vadd.f32 %v820_v46, %v367_v40 }
 0x1bc   :  { %v459_v20 = vperm.slane %v406_v5, %v458_v4 }
 0x1be   :  { %v461_v35 = vsel %vm460_vm9, %v459_v20, %v457_v31 }
 0x1c7   :  { %v370_v42 = vpop.xlane.xlu2 %369 }
 0x1c8   :  { %v407_v8 = vadd.f32 %v820_v46, %v370_v42 }
 0x1ca   :  { %v463_v24 = vperm.slane %v407_v8, %v462_v7 }
 0x1cc   :  { %v465_v37 = vsel %vm464_vm10, %v463_v24, %v461_v35 }
 0x1cf   :  { %v373_v44 = vpop.xlane.xlu1 %372 }
 0x1d0   :  { %v408_v12 = vadd.f32 %v820_v46, %v373_v44 }
 0x1d2   :  { %v467_v28 = vperm.slane %v408_v12, %v466_v11 }
 0x1d4   :  { %v469_v39 = vsel %vm468_vm11, %v467_v28, %v465_v37 }
 0x1d7   :  { %v376_v45 = vpop.xlane.xlu2 %375 }
 0x1d8   :  { %v409_v16 = vadd.f32 %v820_v46, %v376_v45 }
 0x1da   :  { %v471_v32 = vperm.slane %v409_v16, %v470_v15 }
 0x1dc   :  { %v473_v42 = vsel %vm472_vm12, %v471_v32, %v469_v39 }
 0x1df   :  { %v379_v55 = vpop.xlane.xlu1 %378 }
 0x1e0   :  { %v410_v22 = vadd.f32 %v820_v46, %v379_v55 }
 0x1e2   :  { %v475_v36 = vperm.slane %v410_v22, %v474_v21 }
 0x1e4   :  { %v477_v45 = vsel %vm476_vm13, %v475_v36, %v473_v42 }
 0x1e7   :  { %v382_v58 = vpop.xlane.xlu2 %381 }
 0x1e8   :  { %v411_v26 = vadd.f32 %v820_v46, %v382_v58 }
 0x1ea   :  { %v479_v38 = vperm.slane %v411_v26, %v478_v25 }
 0x1ec   :  { %v481_v47 = vsel %vm480_vm14, %v479_v38, %v477_v45 }
 0x1ef   :  { %v385_v18 = vpop.xlane.xlu1 %384 }
 0x1f0   :  { %v412_v30 = vadd.f32 %v820_v46, %v385_v18 }
 0x1f2   :  { %v483_v40 = vperm.slane %v412_v30, %v482_v29 }
 0x1f4   :  { %v485_v48 = vsel %vm484_vm15, %v483_v40, %v481_v47 }
 0x1f7   :  { %v388_v23 = vpop.xlane.xlu2 %387 }
 0x1f8   :  { %v413_v34 = vadd.f32 %v820_v46, %v388_v23 }
 0x1fa   :  { %v487_v43 = vperm.slane %v413_v34, %v486_v33 }
 0x1fc   :  { %v489_v50 = vsel %vm488_vm0, %v487_v43, %v485_v48 }
 0x1ff   :  { %v391_v44 = vpop.xlane.xlu0 %390 }
 0x200   :  { %v414_v17 = vadd.f32 %v820_v46, %v391_v44 }
 0x202   :  { %v491_v49 = vperm.slane %v414_v17, %v490_v41 }
 0x204   :  { %v493_v14 = vsel %vm492_vm1, %v491_v49, %v489_v50 }
 0x205   :  { %495 = vst [vmem:[#allocation3] sm:$0x1] %v493_v14 }
 0x206   :  { %506 = dma.vmem_to_hbm [thread:$0]  %s502_s5, 16, %s504_s9, [#allocation4]  }
 0x207   :  { %584 = dma.done.wait [#allocation4], 16  }
 0x208   :  { %585 = vsyncadd [#allocation4], 4294967280 }
 0x209   :  { %511 = vsyncpa [#allocation4], 1 }

</bundles_post_ra>
